<compile_context>
chip_gen: v6e
topology: v6e:2x2x1
jax: 0.10.0
libtpu: 0.0.40
codegen_flags: <defaults>
</compile_context>

<pallas_src>
import math

import jax
import jax.numpy as jnp
from jax.experimental import pallas as pl
from jax.experimental.pallas import tpu as pltpu


# ---------------------------------------------------------------------------
# Kernel: out = x + pe  (pe broadcast over the batch/sublane dimension)
# ---------------------------------------------------------------------------
def posenc_kernel(x_ref, pe_ref, o_ref):
    # x_ref:  (ts, N, E)
    # pe_ref: (ts, 1, E)   -> broadcasts over N (sublane broadcast)
    # o_ref:  (ts, N, E)
    o_ref[...] = (x_ref[...] + pe_ref[...]).astype(o_ref.dtype)


# ---------------------------------------------------------------------------
# "Module init": build the sinusoidal buffer once (register_buffer analogue)
# ---------------------------------------------------------------------------
def make_positional_encoding(emb_size: int, max_len: int = 512,
                             dtype=jnp.float32):
    position = jnp.arange(max_len, dtype=jnp.float32)[:, None]            # (L, 1)
    div_term = jnp.exp(
        jnp.arange(0, emb_size, 2, dtype=jnp.float32)
        * (-math.log(10000.0) / emb_size))                                # (ceil(E/2),)
    angles = position * div_term                                          # (L, ceil(E/2))
    pe = jnp.zeros((max_len, emb_size), jnp.float32)
    pe = pe.at[:, 0::2].set(jnp.sin(angles))
    pe = pe.at[:, 1::2].set(jnp.cos(angles)[:, : emb_size // 2])          # odd-E safe
    # Build in the model dtype so pe DMA bytes match the activations.
    return pe[:, None, :].astype(dtype)                                   # (L, 1, E)


# ---------------------------------------------------------------------------
# Tile sizing: biggest S-tile under a fixed byte budget (keeps 2x x-tile +
# 2x out-tile + pe-tile comfortably inside scoped VMEM on v5e/v6e/v7x).
# ---------------------------------------------------------------------------
def _choose_tile_rows(s, n, e, itemsize, target_tile_bytes):
    bytes_per_row = max(1, n * e * itemsize)
    rows = max(1, target_tile_bytes // bytes_per_row)
    if rows >= 8:
        rows = (rows // 8) * 8
    return int(min(rows, s))


# ---------------------------------------------------------------------------
# Pallas forward: single pallas_call, grid tiled over S, auto-pipelined
# ---------------------------------------------------------------------------
def positional_encoding_forward(x, pe, *, donate_x=False,
                                target_tile_bytes=2 * 1024 * 1024):
    """x: (S, N, E); pe: (max_len, 1, E). Returns x + pe[:S]."""
    s, n, e = x.shape
    assert pe.ndim == 3 and pe.shape[0] >= s and pe.shape[1] == 1 and pe.shape[2] == e

    itemsize = jnp.dtype(x.dtype).itemsize
    ts = _choose_tile_rows(s, n, e, itemsize, target_tile_bytes)
    grid = (pl.cdiv(s, ts),)

    cost = pl.CostEstimate(
        flops=s * n * e,
        transcendentals=0,
        bytes_accessed=(2 * s * n * e) * itemsize
        + s * e * jnp.dtype(pe.dtype).itemsize,
    )

    return pl.pallas_call(
        posenc_kernel,
        out_shape=jax.ShapeDtypeStruct((s, n, e), x.dtype),
        grid=grid,
        in_specs=[
            # x tile: (ts, N, E), walks along S with the grid.
            pl.BlockSpec((ts, n, e), lambda i: (i, 0, 0)),
            # pe tile: only the matching S rows of the (max_len, 1, E) buffer
            # are DMA'd; the batch broadcast happens in-kernel.
            pl.BlockSpec((ts, 1, e), lambda i: (i, 0, 0)),
        ],
        out_specs=pl.BlockSpec((ts, n, e), lambda i: (i, 0, 0)),
        compiler_params=pltpu.CompilerParams(
            dimension_semantics=("parallel",),          # no reduction axis
            vmem_limit_bytes=32 * 1024 * 1024,          # explicit, safe on all gens
        ),
        cost_estimate=cost,
        input_output_aliases={0: 0} if donate_x else {},
    )(x, pe)


# ---------------------------------------------------------------------------
# Public entry: gate on size — tiny inputs are pure launch overhead, so a
# plain fused XLA add wins there; the kernel is used at real scale.
# ---------------------------------------------------------------------------
def positional_encoding(x, pe, *, min_kernel_bytes=1 << 20, donate_x=False):
    s = x.shape[0]
    if x.size * jnp.dtype(x.dtype).itemsize < min_kernel_bytes:
        return x + pe[:s].astype(x.dtype)
    return positional_encoding_forward(x, pe, donate_x=donate_x)


# ---------------------------------------------------------------------------
# Pure-JAX reference (mirrors the PyTorch forward exactly)
# ---------------------------------------------------------------------------
def reference_forward(x, pe):
    seq_len = x.shape[0]
    return x + pe[:seq_len]


# ---------------------------------------------------------------------------
# Main
# ---------------------------------------------------------------------------
if __name__ == "__main__":
    SEQ, BATCH, EMB, MAX_LEN = 8, 2, 32, 512

    key = jax.random.PRNGKey(0)
    x = jax.random.normal(key, (SEQ, BATCH, EMB), jnp.float32)

    pe = make_positional_encoding(EMB, MAX_LEN, dtype=x.dtype)   # built once at "init"

    # Exercise the Pallas kernel directly (the gated entry would pick plain
    # XLA at this toy size).
    out = positional_encoding_forward(x, pe)
    out = jax.block_until_ready(out)

    ref = reference_forward(x, pe)
    assert out.shape == (SEQ, BATCH, EMB), out.shape
    assert jnp.allclose(out, ref, atol=1e-6, rtol=1e-6), (
        float(jnp.max(jnp.abs(out - ref))))

    # Gated public entry point (falls back to fused XLA at this size).
    out2 = jax.block_until_ready(positional_encoding(x, pe))
    assert jnp.allclose(out2, ref, atol=1e-6, rtol=1e-6)

    print("KERNEL_OK")
</pallas_src>

<mosaic_0001>
module attributes {stable_mosaic.version = 11 : i64} {
  func.func @posenc_kernel(%arg0: i32, %arg1: memref<8x2x32xf32, #tpu.memory_space<vmem>>, %arg2: memref<8x1x32xf32, #tpu.memory_space<vmem>>, %arg3: memref<8x2x32xf32, #tpu.memory_space<vmem>>) attributes {dimension_semantics = [#tpu.dimension_semantics<parallel>], iteration_bounds = array<i64: 1>, scalar_prefetch = 0 : i64, scratch_operands = 0 : i64, tpu.core_type = #tpu.core_type<tc>, window_params = [{transform_indices = @transform_0, window_bounds = array<i64: 8, 2, 32>}, {transform_indices = @transform_1, window_bounds = array<i64: 8, 1, 32>}, {transform_indices = @transform_2, window_bounds = array<i64: 8, 2, 32>}]} {
    %c0 = arith.constant 0 : index
    %c0_0 = arith.constant 0 : index
    %c0_1 = arith.constant 0 : index
    %0 = vector.load %arg1[%c0, %c0_0, %c0_1] : memref<8x2x32xf32, #tpu.memory_space<vmem>>, vector<8x2x32xf32>
    %c0_2 = arith.constant 0 : index
    %c0_3 = arith.constant 0 : index
    %c0_4 = arith.constant 0 : index
    %1 = vector.load %arg2[%c0_2, %c0_3, %c0_4] : memref<8x1x32xf32, #tpu.memory_space<vmem>>, vector<8x1x32xf32>
    %2 = vector.broadcast %1 : vector<8x1x32xf32> to vector<8x2x32xf32>
    %3 = arith.addf %0, %2 : vector<8x2x32xf32>
    %c0_5 = arith.constant 0 : index
    %c0_6 = arith.constant 0 : index
    %c0_7 = arith.constant 0 : index
    %4 = vector.load %arg3[%c0_5, %c0_6, %c0_7] : memref<8x2x32xf32, #tpu.memory_space<vmem>>, vector<8x2x32xf32>
    tpu.vector_store %arg3[%c0_5, %c0_6, %c0_7], %3 {strides = array<i32>} : memref<8x2x32xf32, #tpu.memory_space<vmem>>, vector<8x2x32xf32>,
    return
  }
  func.func @transform_0(%arg0: i32) -> (i32, i32, i32) {
    %c0_i32 = arith.constant 0 : i32
    %c0_i32_0 = arith.constant 0 : i32
    %c0_i32_1 = arith.constant 0 : i32
    return %arg0, %c0_i32, %c0_i32_0 : i32, i32, i32
  }
  func.func @transform_1(%arg0: i32) -> (i32, i32, i32) {
    %c0_i32 = arith.constant 0 : i32
    %c0_i32_0 = arith.constant 0 : i32
    %c0_i32_1 = arith.constant 0 : i32
    return %arg0, %c0_i32, %c0_i32_0 : i32, i32, i32
  }
  func.func @transform_2(%arg0: i32) -> (i32, i32, i32) {
    %c0_i32 = arith.constant 0 : i32
    %c0_i32_0 = arith.constant 0 : i32
    %c0_i32_1 = arith.constant 0 : i32
    return %arg0, %c0_i32, %c0_i32_0 : i32, i32, i32
  }
}

</mosaic_0001>

<bundles_post_ra>
// kernel: tpu_custom_call.1
= control target key start
LH: loop header
LB: loop body
LE: loop exit
PB: predicated region body
PF: predicated region fallthrough
CT: control target
= control target key end

     0   :  { %vm84_vm0 = vcmask 254976   ;;  %s219_s0 = inlined_call_operand.vmem [shape: f32[8,2,32], index: 0, kind: input, shape index: {}]   ;;  %s220_s1 = inlined_call_operand.vmem [shape: f32[512,1,32], index: 1, kind: input, shape index: {}]   ;;  %s221_s2 = inlined_call_operand.hbm [shape: f32[8,2,32], index: 2, kind: output, shape index: {}]  }
   0x1   :  { %v12_v0 = vld [vmem:[%s219_s0] sm:$0x3]  ;;  %v13_v3 = vld [vmem:[%s219_s0 + $0x2] sm:$0x3]  ;;  %v14_v5 = vld [vmem:[%s219_s0 + $0x4] sm:$0x3] }
   0x2   :  { %v109_v1 = vld [vmem:[%s220_s1] ss:$0 sm:$0xff]  ;;  %v110_v4 = vld [vmem:[%s220_s1 + $0x1] ss:$0 sm:$0xff]  ;;  %v111_v7 = vld [vmem:[%s220_s1 + $0x2] ss:$0 sm:$0xff] }
   0x3   :  { %v76_v2 = vadd.f32 %v109_v1, %v12_v0  ;;  %v77_v6 = vadd.f32 %v110_v4, %v13_v3  ;;  %v15_v8 = vld [vmem:[%s219_s0 + $0x6] sm:$0x3]  ;;  %v112_v9 = vld [vmem:[%s220_s1 + $0x3] ss:$0 sm:$0xff]  ;;  %v78_v10 = vadd.f32 %v111_v7, %v14_v5  ;;  %v16_v12 = vld [vmem:[%s219_s0 + $0x8] sm:$0x3] }
   0x4   :  { %v79_v11 = vadd.f32 %v112_v9, %v15_v8  ;;  %v113_v13 = vld [vmem:[%s220_s1 + $0x4] ss:$0 sm:$0xff]  ;;  %v17_v14 = vld [vmem:[%s219_s0 + $0xa] sm:$0x3]  ;;  %v114_v16 = vld [vmem:[%s220_s1 + $0x5] ss:$0 sm:$0xff] }
   0x5   :  { %85 = vst.msk [vmem:[#allocation2] sm:$0x3] %vm84_vm0, %v76_v2  ;;  %86 = vst.msk [vmem:[#allocation2 + $0x2] sm:$0x3] %vm84_vm0, %v77_v6  ;;  %v80_v15 = vadd.f32 %v113_v13, %v16_v12  ;;  %v18_v17 = vld [vmem:[%s219_s0 + $0xc] sm:$0x3]  ;;  %v81_v19 = vadd.f32 %v114_v16, %v17_v14 }
   0x6   :  { %v115_v18 = vld [vmem:[%s220_s1 + $0x6] ss:$0 sm:$0xff]  ;;  %87 = vst.msk [vmem:[#allocation2 + $0x4] sm:$0x3] %vm84_vm0, %v78_v10  ;;  %88 = vst.msk [vmem:[#allocation2 + $0x6] sm:$0x3] %vm84_vm0, %v79_v11 }
   0x7   :  { %v82_v20 = vadd.f32 %v115_v18, %v18_v17  ;;  %v19_v21 = vld [vmem:[%s219_s0 + $0xe] sm:$0x3]  ;;  %v116_v22 = vld [vmem:[%s220_s1 + $0x7] ss:$0 sm:$0xff] }
   0x8   :  { %7 = vsyncpa [#allocation3], 0  ;;  %89 = vst.msk [vmem:[#allocation2 + $0x8] sm:$0x3] %vm84_vm0, %v80_v15  ;;  %v83_v23 = vadd.f32 %v116_v22, %v19_v21  ;;  %s142_s13 = smov [#allocation2]  }
   0x9   :  { %s98_s14 = sshll.u32 %s142_s13, 4  ;;  %90 = vst.msk [vmem:[#allocation2 + $0xa] sm:$0x3] %vm84_vm0, %v81_v19  ;;  %91 = vst.msk [vmem:[#allocation2 + $0xc] sm:$0x3] %vm84_vm0, %v82_v20  ;;  %s99_s14 = int_to_ptr.vmem [resolvable:$true] %s98_s14 }
   0xa   :  { %92 = vst.msk [vmem:[#allocation2 + $0xe] sm:$0x3] %vm84_vm0, %v83_v23  ;;  %s120_s15 = scalar_lea.vmem %s99_s14, 256  ;;  %p125_p1 = scmp.lt.s32.totalorder %s99_s14, %s99_s14 }
   0xb   :  { %p121_p0 = scmp.ne.s32.totalorder %s99_s14, %s120_s15  ;;  %p126_p2 = scmp.lt.s32.totalorder %s120_s15, %s120_s15 }
   0xd   :  { %p127_p3 = por %p126_p2, %p125_p1 }
   0xf   :  { %p128_p4 = pnand %p127_p3, %p121_p0 }
  0x11   :  { %131 = shalt.err (!%p128_p4)
}
  0x12   :  { %s143_s0 = smov 32   ;;  %s144_s1 = smov 2  }
  0x13   :  { %104 = dma.vmem_to_hbm [thread:$0]  %s99_s14, 256, %s221_s2, [#allocation3], %s143_s0, %s143_s0, %s144_s1  }
  0x14   :  { %140 = dma.done.wait [#allocation3], 256  }
  0x15   :  { %141 = vsyncadd [#allocation3], 4294967040 }
  0x16   :  { %108 = vsyncpa [#allocation3], 1 }

</bundles_post_ra>
